<compile_context>
chip_gen: v6e
topology: v6e:2x2x1
jax: 0.10.0
libtpu: 0.0.40
codegen_flags: <defaults>
</compile_context>

<pallas_src>
import math
import functools

import jax
import jax.numpy as jnp
from jax import lax
from jax.experimental import pallas as pl
from jax.experimental.pallas import tpu as pltpu


def _pick_tile(n, preferred=256):
    """Largest tile <= preferred (multiple of 16) dividing n, else n (full dim)."""
    if n <= preferred:
        return n
    for t in range(preferred, 15, -16):
        if n % t == 0:
            return t
    return n


def _vmem_limit(bytes_needed):
    try:
        cap = int(pltpu.get_tpu_info().vmem_capacity_bytes)
    except Exception:  # conservative fallback (v7x has 64 MiB per TC)
        cap = 64 << 20
    hi = cap - (2 << 20)  # headroom below physical VMEM
    return int(max(min(bytes_needed, hi), min(32 << 20, hi)))


# ---------------------------------------------------------------------------
# Kernel 1: fused Q/K/V projections, head-split output layout (B, H, S, DK).
# ---------------------------------------------------------------------------
def _proj_kernel(xq_ref, xk_ref, xv_ref,
                 wq_ref, wk_ref, wv_ref,
                 bq_ref, bk_ref, bv_ref,
                 qh_ref, kh_ref, vh_ref,
                 *, num_head, d_k):
    scale = 1.0 / math.sqrt(d_k)

    def proj(x_ref, w_ref, b_ref, out_ref, sc):
        # bf16 MXU operands, f32 accumulation; bias add + scale in f32.
        y = jnp.dot(x_ref[...], w_ref[...],
                    preferred_element_type=jnp.float32) + b_ref[...]
        if sc != 1.0:
            y = y * sc
        # Head-split write: (TS, D) -> (H, TS, DK), static slices only.
        for h in range(num_head):
            lo = h * d_k
            out_ref[h] = y[:, lo:lo + d_k].astype(out_ref.dtype)

    proj(xq_ref, wq_ref, bq_ref, qh_ref, scale)   # 1/sqrt(d_k) folded into Q
    proj(xk_ref, wk_ref, bk_ref, kh_ref, 1.0)
    proj(xv_ref, wv_ref, bv_ref, vh_ref, 1.0)


# ---------------------------------------------------------------------------
# Kernel 2: flash attention (online softmax over keys) + fused output
# projection accumulated over heads into the resident output block.
# ---------------------------------------------------------------------------
def _flash_attn_kernel(q_ref, k_ref, v_ref, wo_ref, bo_ref, o_ref,
                       m_sc, l_sc, acc_sc):
    h = pl.program_id(2)
    kv = pl.program_id(3)

    @pl.when(kv == 0)
    def _():
        m_sc[...] = jnp.full_like(m_sc, -jnp.inf)
        l_sc[...] = jnp.zeros_like(l_sc)
        acc_sc[...] = jnp.zeros_like(acc_sc)

    # scores (TQ, TK): contract last dims of Q and K -> no materialized transpose.
    s = lax.dot_general(q_ref[...], k_ref[...], (((1,), (1,)), ((), ())),
                        preferred_element_type=jnp.float32)
    # dropout(p=0.0) on the pre-softmax scores -> identity.
    m_prev = m_sc[...]
    m_new = jnp.maximum(m_prev, jnp.max(s, axis=-1, keepdims=True))
    alpha = jnp.exp(m_prev - m_new)
    e = jnp.exp(s - m_new)                                        # f32 stats (v5e)
    l_sc[...] = alpha * l_sc[...] + jnp.sum(e, axis=-1, keepdims=True)
    acc_sc[...] = alpha * acc_sc[...] + jnp.dot(
        e.astype(v_ref.dtype), v_ref[...], preferred_element_type=jnp.float32)
    m_sc[...] = m_new

    @pl.when(kv == pl.num_programs(3) - 1)
    def _():
        # Normalize AFTER the PV matmul: (TQ, DK) multiply instead of (S, S).
        inv = pl.reciprocal(l_sc[...], approx=True)
        ctx = (acc_sc[...] * inv).astype(v_ref.dtype)             # (TQ, DK) bf16
        part = jnp.dot(ctx, wo_ref[...],
                       preferred_element_type=jnp.float32)        # (TQ, D)

        @pl.when(h == 0)
        def _():
            o_ref[...] = (part + bo_ref[...]).astype(o_ref.dtype)

        @pl.when(h != 0)
        def _():
            o_ref[...] = o_ref[...] + part.astype(o_ref.dtype)


# ---------------------------------------------------------------------------
# Wrapper. Weights are stored (in_features, out_features) so y = x @ W + b.
# ---------------------------------------------------------------------------
def mha_forward(q, k, v, params, num_head):
    B, S, D = q.shape
    H = num_head
    assert D % H == 0, "d_model must be divisible by num_head"
    DK = D // H

    cdt = jnp.bfloat16     # MXU operand dtype (f32 accumulation everywhere)

    xq, xk, xv = q.astype(cdt), k.astype(cdt), v.astype(cdt)
    wq, wk, wv = (params["wq"].astype(cdt), params["wk"].astype(cdt),
                  params["wv"].astype(cdt))
    wo_h = params["wo"].astype(cdt).reshape(H, DK, D)       # per-head Wo slices
    bq = params["bq"].reshape(1, D).astype(jnp.float32)
    bk = params["bk"].reshape(1, D).astype(jnp.float32)
    bv = params["bv"].reshape(1, D).astype(jnp.float32)
    bo = params["bo"].reshape(1, D).astype(jnp.float32)

    TS = _pick_tile(S, 512)
    TQ = _pick_tile(S, 256)
    TK = _pick_tile(S, 512)

    # ------------------------- Kernel 1 call -------------------------
    x_spec = pl.BlockSpec((None, TS, D), lambda b, si: (b, si, 0))
    w_spec = pl.BlockSpec((D, D), lambda b, si: (0, 0))      # resident across grid
    b_spec = pl.BlockSpec((1, D), lambda b, si: (0, 0))
    h_spec = pl.BlockSpec((None, H, TS, DK), lambda b, si: (b, 0, si, 0))

    proj_need = int(1.5 * (3 * 2 * TS * D * 2 + 3 * 2 * D * D * 2 + 3 * 2 * D * 4
                           + 3 * 2 * TS * D * 2 + 6 * TS * D * 4)) + (4 << 20)
    proj_cost = pl.CostEstimate(
        flops=6 * B * S * D * D,
        transcendentals=0,
        bytes_accessed=6 * B * S * D * 2 + 3 * D * D * 2 + 3 * D * 4)

    hs = jax.ShapeDtypeStruct((B, H, S, DK), cdt)
    qh, kh, vh = pl.pallas_call(
        functools.partial(_proj_kernel, num_head=H, d_k=DK),
        out_shape=(hs, hs, hs),
        grid_spec=pltpu.PrefetchScalarGridSpec(
            num_scalar_prefetch=0,
            grid=(B, S // TS),
            in_specs=[x_spec, x_spec, x_spec,
                      w_spec, w_spec, w_spec,
                      b_spec, b_spec, b_spec],
            out_specs=[h_spec, h_spec, h_spec]),
        compiler_params=pltpu.CompilerParams(
            dimension_semantics=("parallel", "parallel"),
            vmem_limit_bytes=_vmem_limit(proj_need)),
        cost_estimate=proj_cost,
    )(xq, xk, xv, wq, wk, wv, bq, bk, bv)

    # ------------------------- Kernel 2 call -------------------------
    q_spec = pl.BlockSpec((None, None, TQ, DK), lambda b, qi, h, kvi: (b, h, qi, 0))
    kv_spec = pl.BlockSpec((None, None, TK, DK), lambda b, qi, h, kvi: (b, h, kvi, 0))
    wo_spec = pl.BlockSpec((None, DK, D), lambda b, qi, h, kvi: (h, 0, 0))
    bo_spec = pl.BlockSpec((1, D), lambda b, qi, h, kvi: (0, 0))
    o_spec = pl.BlockSpec((None, TQ, D), lambda b, qi, h, kvi: (b, qi, 0))

    attn_need = int(1.5 * (2 * TQ * DK * 2 + 2 * 2 * TK * DK * 2
                           + 2 * DK * D * 2 + 2 * D * 4
                           + 2 * TQ * D * 4
                           + (2 * TQ + TQ * DK) * 4
                           + 6 * TQ * TK * 4)) + (4 << 20)
    attn_cost = pl.CostEstimate(
        flops=4 * B * H * S * S * DK + 2 * B * S * D * D,
        transcendentals=2 * B * H * S * S,
        bytes_accessed=3 * B * S * D * 2 + D * D * 2 + D * 4 + B * S * D * 4)

    out = pl.pallas_call(
        _flash_attn_kernel,
        out_shape=jax.ShapeDtypeStruct((B, S, D), jnp.float32),
        grid_spec=pltpu.PrefetchScalarGridSpec(
            num_scalar_prefetch=0,
            grid=(B, S // TQ, H, S // TK),
            in_specs=[q_spec, kv_spec, kv_spec, wo_spec, bo_spec],
            out_specs=o_spec,
            scratch_shapes=[pltpu.VMEM((TQ, 1), jnp.float32),    # running max
                            pltpu.VMEM((TQ, 1), jnp.float32),    # running denom
                            pltpu.VMEM((TQ, DK), jnp.float32)]), # PV accumulator
        compiler_params=pltpu.CompilerParams(
            dimension_semantics=("parallel", "parallel", "arbitrary", "arbitrary"),
            vmem_limit_bytes=_vmem_limit(attn_need)),
        cost_estimate=attn_cost,
    )(qh, kh, vh, wo_h, bo)

    return out.astype(q.dtype)


# ---------------------------------------------------------------------------
# Pure-JAX f32 reference (mirrors the PyTorch forward with mask=None, p=0.0).
# ---------------------------------------------------------------------------
def mha_reference(q, k, v, params, num_head):
    B, S, D = q.shape
    H, DK = num_head, D // num_head

    Qp = q @ params["wq"] + params["bq"]
    Kp = k @ params["wk"] + params["bk"]
    Vp = v @ params["wv"] + params["bv"]

    def split(x):
        return x.reshape(B, S, H, DK).transpose(0, 2, 1, 3)   # (B,H,S,DK)

    Qh, Kh, Vh = split(Qp), split(Kp), split(Vp)
    scores = jnp.einsum("bhqd,bhkd->bhqk", Qh, Kh) / math.sqrt(DK)
    probs = jax.nn.softmax(scores, axis=-1)
    ctx = jnp.einsum("bhqk,bhkd->bhqd", probs, Vh)
    ctx = ctx.transpose(0, 2, 1, 3).reshape(B, S, D)
    return ctx @ params["wo"] + params["bo"]


if __name__ == "__main__":
    B, S, D_MODEL, NUM_HEAD = 2, 8, 32, 4
    DROPOUT = 0.0  # identity (eval semantics)

    key = jax.random.PRNGKey(0)
    keys = jax.random.split(key, 12)

    def w_init(kk):
        return jax.random.normal(kk, (D_MODEL, D_MODEL), jnp.float32) * 0.02

    def b_init(kk):
        return jax.random.normal(kk, (D_MODEL,), jnp.float32) * 0.02

    params = {
        "wq": w_init(keys[0]), "bq": b_init(keys[1]),
        "wk": w_init(keys[2]), "bk": b_init(keys[3]),
        "wv": w_init(keys[4]), "bv": b_init(keys[5]),
        "wo": w_init(keys[6]), "bo": b_init(keys[7]),
    }

    q = jax.random.normal(keys[8], (B, S, D_MODEL), jnp.float32)
    k = jax.random.normal(keys[9], (B, S, D_MODEL), jnp.float32)
    v = jax.random.normal(keys[10], (B, S, D_MODEL), jnp.float32)

    out = mha_forward(q, k, v, params, NUM_HEAD)
    out = jax.block_until_ready(out)

    ref = mha_reference(q, k, v, params, NUM_HEAD)
    assert out.shape == (B, S, D_MODEL)
    err = float(jnp.max(jnp.abs(out - ref)))
    # bf16 MXU operands (f32 accumulation) vs. the f32 reference.
    assert err < 1e-2, f"max abs err {err}"

    print("KERNEL_OK")
</pallas_src>

<mosaic_0001>
module attributes {stable_mosaic.version = 11 : i64} {
  func.func @_proj_kernel(%arg0: i32, %arg1: i32, %arg2: memref<1x8x32xbf16, #tpu.memory_space<vmem>>, %arg3: memref<1x8x32xbf16, #tpu.memory_space<vmem>>, %arg4: memref<1x8x32xbf16, #tpu.memory_space<vmem>>, %arg5: memref<32x32xbf16, #tpu.memory_space<vmem>>, %arg6: memref<32x32xbf16, #tpu.memory_space<vmem>>, %arg7: memref<32x32xbf16, #tpu.memory_space<vmem>>, %arg8: memref<1x32xf32, #tpu.memory_space<vmem>>, %arg9: memref<1x32xf32, #tpu.memory_space<vmem>>, %arg10: memref<1x32xf32, #tpu.memory_space<vmem>>, %arg11: memref<1x4x8x8xbf16, #tpu.memory_space<vmem>>, %arg12: memref<1x4x8x8xbf16, #tpu.memory_space<vmem>>, %arg13: memref<1x4x8x8xbf16, #tpu.memory_space<vmem>>) attributes {dimension_semantics = [#tpu.dimension_semantics<parallel>, #tpu.dimension_semantics<parallel>], iteration_bounds = array<i64: 2, 1>, scalar_prefetch = 0 : i64, scratch_operands = 0 : i64, tpu.core_type = #tpu.core_type<tc>, window_params = [{transform_indices = @transform_0, window_bounds = array<i64: 1, 8, 32>}, {transform_indices = @transform_1, window_bounds = array<i64: 1, 8, 32>}, {transform_indices = @transform_2, window_bounds = array<i64: 1, 8, 32>}, {pipeline_mode = #tpu.pipeline_mode<synchronous>, transform_indices = @transform_3, window_bounds = array<i64: 32, 32>}, {pipeline_mode = #tpu.pipeline_mode<synchronous>, transform_indices = @transform_4, window_bounds = array<i64: 32, 32>}, {pipeline_mode = #tpu.pipeline_mode<synchronous>, transform_indices = @transform_5, window_bounds = array<i64: 32, 32>}, {pipeline_mode = #tpu.pipeline_mode<synchronous>, transform_indices = @transform_6, window_bounds = array<i64: 1, 32>}, {pipeline_mode = #tpu.pipeline_mode<synchronous>, transform_indices = @transform_7, window_bounds = array<i64: 1, 32>}, {pipeline_mode = #tpu.pipeline_mode<synchronous>, transform_indices = @transform_8, window_bounds = array<i64: 1, 32>}, {transform_indices = @transform_9, window_bounds = array<i64: 1, 4, 8, 8>}, {transform_indices = @transform_10, window_bounds = array<i64: 1, 4, 8, 8>}, {transform_indices = @transform_11, window_bounds = array<i64: 1, 4, 8, 8>}]} {
    %c0 = arith.constant 0 : index
    %c0_0 = arith.constant 0 : index
    %c0_1 = arith.constant 0 : index
    %0 = vector.load %arg2[%c0, %c0_0, %c0_1] : memref<1x8x32xbf16, #tpu.memory_space<vmem>>, vector<1x8x32xbf16>
    %1 = vector.shape_cast %0 : vector<1x8x32xbf16> to vector<8x32xbf16>
    %c0_2 = arith.constant 0 : index
    %c0_3 = arith.constant 0 : index
    %2 = vector.load %arg5[%c0_2, %c0_3] : memref<32x32xbf16, #tpu.memory_space<vmem>>, vector<32x32xbf16>
    %cst = arith.constant dense<0.000000e+00> : vector<8x32xf32>
    %3 = tpu.matmul %1, %2, %cst {dimension_numbers = #tpu.dot_dimension_numbers<[1], [0], [0], [1], [0, 0, 1, 1], [], []>} : vector<8x32xbf16>, vector<32x32xbf16>, vector<8x32xf32> -> vector<8x32xf32>
    %c0_4 = arith.constant 0 : index
    %c0_5 = arith.constant 0 : index
    %4 = vector.load %arg8[%c0_4, %c0_5] : memref<1x32xf32, #tpu.memory_space<vmem>>, vector<1x32xf32>
    %5 = vector.broadcast %4 : vector<1x32xf32> to vector<8x32xf32>
    %6 = arith.addf %3, %5 : vector<8x32xf32>
    %cst_6 = arith.constant 0.353553385 : f32
    %7 = vector.broadcast %cst_6 : f32 to vector<8x32xf32>
    %8 = arith.mulf %6, %7 : vector<8x32xf32>
    %9 = vector.extract_strided_slice %8 {offsets = [0, 0], sizes = [8, 8], strides = [1, 1]} : vector<8x32xf32> to vector<8x8xf32>
    %10 = arith.truncf %9 : vector<8x8xf32> to vector<8x8xbf16>
    %c0_7 = arith.constant 0 : index
    %c0_8 = arith.constant 0 : index
    %c0_9 = arith.constant 0 : index
    %c0_10 = arith.constant 0 : index
    %11 = vector.load %arg11[%c0_7, %c0_8, %c0_9, %c0_10] : memref<1x4x8x8xbf16, #tpu.memory_space<vmem>>, vector<1x1x8x8xbf16>
    %12 = vector.shape_cast %11 : vector<1x1x8x8xbf16> to vector<8x8xbf16>
    %13 = vector.shape_cast %10 : vector<8x8xbf16> to vector<1x1x8x8xbf16>
    tpu.vector_store %arg11[%c0_7, %c0_8, %c0_9, %c0_10], %13 {strides = array<i32>} : memref<1x4x8x8xbf16, #tpu.memory_space<vmem>>, vector<1x1x8x8xbf16>,
    %14 = vector.extract_strided_slice %8 {offsets = [0, 8], sizes = [8, 8], strides = [1, 1]} : vector<8x32xf32> to vector<8x8xf32>
    %15 = arith.truncf %14 : vector<8x8xf32> to vector<8x8xbf16>
    %c0_11 = arith.constant 0 : index
    %c1 = arith.constant 1 : index
    %c0_12 = arith.constant 0 : index
    %c0_13 = arith.constant 0 : index
    %16 = vector.load %arg11[%c0_11, %c1, %c0_12, %c0_13] : memref<1x4x8x8xbf16, #tpu.memory_space<vmem>>, vector<1x1x8x8xbf16>
    %17 = vector.shape_cast %16 : vector<1x1x8x8xbf16> to vector<8x8xbf16>
    %18 = vector.shape_cast %15 : vector<8x8xbf16> to vector<1x1x8x8xbf16>
    tpu.vector_store %arg11[%c0_11, %c1, %c0_12, %c0_13], %18 {strides = array<i32>} : memref<1x4x8x8xbf16, #tpu.memory_space<vmem>>, vector<1x1x8x8xbf16>,
    %19 = vector.extract_strided_slice %8 {offsets = [0, 16], sizes = [8, 8], strides = [1, 1]} : vector<8x32xf32> to vector<8x8xf32>
    %20 = arith.truncf %19 : vector<8x8xf32> to vector<8x8xbf16>
    %c0_14 = arith.constant 0 : index
    %c2 = arith.constant 2 : index
    %c0_15 = arith.constant 0 : index
    %c0_16 = arith.constant 0 : index
    %21 = vector.load %arg11[%c0_14, %c2, %c0_15, %c0_16] : memref<1x4x8x8xbf16, #tpu.memory_space<vmem>>, vector<1x1x8x8xbf16>
    %22 = vector.shape_cast %21 : vector<1x1x8x8xbf16> to vector<8x8xbf16>
    %23 = vector.shape_cast %20 : vector<8x8xbf16> to vector<1x1x8x8xbf16>
    tpu.vector_store %arg11[%c0_14, %c2, %c0_15, %c0_16], %23 {strides = array<i32>} : memref<1x4x8x8xbf16, #tpu.memory_space<vmem>>, vector<1x1x8x8xbf16>,
    %24 = vector.extract_strided_slice %8 {offsets = [0, 24], sizes = [8, 8], strides = [1, 1]} : vector<8x32xf32> to vector<8x8xf32>
    %25 = arith.truncf %24 : vector<8x8xf32> to vector<8x8xbf16>
    %c0_17 = arith.constant 0 : index
    %c3 = arith.constant 3 : index
    %c0_18 = arith.constant 0 : index
    %c0_19 = arith.constant 0 : index
    %26 = vector.load %arg11[%c0_17, %c3, %c0_18, %c0_19] : memref<1x4x8x8xbf16, #tpu.memory_space<vmem>>, vector<1x1x8x8xbf16>
    %27 = vector.shape_cast %26 : vector<1x1x8x8xbf16> to vector<8x8xbf16>
    %28 = vector.shape_cast %25 : vector<8x8xbf16> to vector<1x1x8x8xbf16>
    tpu.vector_store %arg11[%c0_17, %c3, %c0_18, %c0_19], %28 {strides = array<i32>} : memref<1x4x8x8xbf16, #tpu.memory_space<vmem>>, vector<1x1x8x8xbf16>,
    %c0_20 = arith.constant 0 : index
    %c0_21 = arith.constant 0 : index
    %c0_22 = arith.constant 0 : index
    %29 = vector.load %arg3[%c0_20, %c0_21, %c0_22] : memref<1x8x32xbf16, #tpu.memory_space<vmem>>, vector<1x8x32xbf16>
    %30 = vector.shape_cast %29 : vector<1x8x32xbf16> to vector<8x32xbf16>
    %c0_23 = arith.constant 0 : index
    %c0_24 = arith.constant 0 : index
    %31 = vector.load %arg6[%c0_23, %c0_24] : memref<32x32xbf16, #tpu.memory_space<vmem>>, vector<32x32xbf16>
    %cst_25 = arith.constant dense<0.000000e+00> : vector<8x32xf32>
    %32 = tpu.matmul %30, %31, %cst_25 {dimension_numbers = #tpu.dot_dimension_numbers<[1], [0], [0], [1], [0, 0, 1, 1], [], []>} : vector<8x32xbf16>, vector<32x32xbf16>, vector<8x32xf32> -> vector<8x32xf32>
    %c0_26 = arith.constant 0 : index
    %c0_27 = arith.constant 0 : index
    %33 = vector.load %arg9[%c0_26, %c0_27] : memref<1x32xf32, #tpu.memory_space<vmem>>, vector<1x32xf32>
    %34 = vector.broadcast %33 : vector<1x32xf32> to vector<8x32xf32>
    %35 = arith.addf %32, %34 : vector<8x32xf32>
    %36 = vector.extract_strided_slice %35 {offsets = [0, 0], sizes = [8, 8], strides = [1, 1]} : vector<8x32xf32> to vector<8x8xf32>
    %37 = arith.truncf %36 : vector<8x8xf32> to vector<8x8xbf16>
    %c0_28 = arith.constant 0 : index
    %c0_29 = arith.constant 0 : index
    %c0_30 = arith.constant 0 : index
    %c0_31 = arith.constant 0 : index
    %38 = vector.load %arg12[%c0_28, %c0_29, %c0_30, %c0_31] : memref<1x4x8x8xbf16, #tpu.memory_space<vmem>>, vector<1x1x8x8xbf16>
    %39 = vector.shape_cast %38 : vector<1x1x8x8xbf16> to vector<8x8xbf16>
    %40 = vector.shape_cast %37 : vector<8x8xbf16> to vector<1x1x8x8xbf16>
    tpu.vector_store %arg12[%c0_28, %c0_29, %c0_30, %c0_31], %40 {strides = array<i32>} : memref<1x4x8x8xbf16, #tpu.memory_space<vmem>>, vector<1x1x8x8xbf16>,
    %41 = vector.extract_strided_slice %35 {offsets = [0, 8], sizes = [8, 8], strides = [1, 1]} : vector<8x32xf32> to vector<8x8xf32>
    %42 = arith.truncf %41 : vector<8x8xf32> to vector<8x8xbf16>
    %c0_32 = arith.constant 0 : index
    %c1_33 = arith.constant 1 : index
    %c0_34 = arith.constant 0 : index
    %c0_35 = arith.constant 0 : index
    %43 = vector.load %arg12[%c0_32, %c1_33, %c0_34, %c0_35] : memref<1x4x8x8xbf16, #tpu.memory_space<vmem>>, vector<1x1x8x8xbf16>
    %44 = vector.shape_cast %43 : vector<1x1x8x8xbf16> to vector<8x8xbf16>
    %45 = vector.shape_cast %42 : vector<8x8xbf16> to vector<1x1x8x8xbf16>
    tpu.vector_store %arg12[%c0_32, %c1_33, %c0_34, %c0_35], %45 {strides = array<i32>} : memref<1x4x8x8xbf16, #tpu.memory_space<vmem>>, vector<1x1x8x8xbf16>,
    %46 = vector.extract_strided_slice %35 {offsets = [0, 16], sizes = [8, 8], strides = [1, 1]} : vector<8x32xf32> to vector<8x8xf32>
    %47 = arith.truncf %46 : vector<8x8xf32> to vector<8x8xbf16>
    %c0_36 = arith.constant 0 : index
    %c2_37 = arith.constant 2 : index
    %c0_38 = arith.constant 0 : index
    %c0_39 = arith.constant 0 : index
    %48 = vector.load %arg12[%c0_36, %c2_37, %c0_38, %c0_39] : memref<1x4x8x8xbf16, #tpu.memory_space<vmem>>, vector<1x1x8x8xbf16>
    %49 = vector.shape_cast %48 : vector<1x1x8x8xbf16> to vector<8x8xbf16>
    %50 = vector.shape_cast %47 : vector<8x8xbf16> to vector<1x1x8x8xbf16>
    tpu.vector_store %arg12[%c0_36, %c2_37, %c0_38, %c0_39], %50 {strides = array<i32>} : memref<1x4x8x8xbf16, #tpu.memory_space<vmem>>, vector<1x1x8x8xbf16>,
    %51 = vector.extract_strided_slice %35 {offsets = [0, 24], sizes = [8, 8], strides = [1, 1]} : vector<8x32xf32> to vector<8x8xf32>
    %52 = arith.truncf %51 : vector<8x8xf32> to vector<8x8xbf16>
    %c0_40 = arith.constant 0 : index
    %c3_41 = arith.constant 3 : index
    %c0_42 = arith.constant 0 : index
    %c0_43 = arith.constant 0 : index
    %53 = vector.load %arg12[%c0_40, %c3_41, %c0_42, %c0_43] : memref<1x4x8x8xbf16, #tpu.memory_space<vmem>>, vector<1x1x8x8xbf16>
    %54 = vector.shape_cast %53 : vector<1x1x8x8xbf16> to vector<8x8xbf16>
    %55 = vector.shape_cast %52 : vector<8x8xbf16> to vector<1x1x8x8xbf16>
    tpu.vector_store %arg12[%c0_40, %c3_41, %c0_42, %c0_43], %55 {strides = array<i32>} : memref<1x4x8x8xbf16, #tpu.memory_space<vmem>>, vector<1x1x8x8xbf16>,
    %c0_44 = arith.constant 0 : index
    %c0_45 = arith.constant 0 : index
    %c0_46 = arith.constant 0 : index
    %56 = vector.load %arg4[%c0_44, %c0_45, %c0_46] : memref<1x8x32xbf16, #tpu.memory_space<vmem>>, vector<1x8x32xbf16>
    %57 = vector.shape_cast %56 : vector<1x8x32xbf16> to vector<8x32xbf16>
    %c0_47 = arith.constant 0 : index
    %c0_48 = arith.constant 0 : index
    %58 = vector.load %arg7[%c0_47, %c0_48] : memref<32x32xbf16, #tpu.memory_space<vmem>>, vector<32x32xbf16>
    %cst_49 = arith.constant dense<0.000000e+00> : vector<8x32xf32>
    %59 = tpu.matmul %57, %58, %cst_49 {dimension_numbers = #tpu.dot_dimension_numbers<[1], [0], [0], [1], [0, 0, 1, 1], [], []>} : vector<8x32xbf16>, vector<32x32xbf16>, vector<8x32xf32> -> vector<8x32xf32>
    %c0_50 = arith.constant 0 : index
    %c0_51 = arith.constant 0 : index
    %60 = vector.load %arg10[%c0_50, %c0_51] : memref<1x32xf32, #tpu.memory_space<vmem>>, vector<1x32xf32>
    %61 = vector.broadcast %60 : vector<1x32xf32> to vector<8x32xf32>
    %62 = arith.addf %59, %61 : vector<8x32xf32>
    %63 = vector.extract_strided_slice %62 {offsets = [0, 0], sizes = [8, 8], strides = [1, 1]} : vector<8x32xf32> to vector<8x8xf32>
    %64 = arith.truncf %63 : vector<8x8xf32> to vector<8x8xbf16>
    %c0_52 = arith.constant 0 : index
    %c0_53 = arith.constant 0 : index
    %c0_54 = arith.constant 0 : index
    %c0_55 = arith.constant 0 : index
    %65 = vector.load %arg13[%c0_52, %c0_53, %c0_54, %c0_55] : memref<1x4x8x8xbf16, #tpu.memory_space<vmem>>, vector<1x1x8x8xbf16>
    %66 = vector.shape_cast %65 : vector<1x1x8x8xbf16> to vector<8x8xbf16>
    %67 = vector.shape_cast %64 : vector<8x8xbf16> to vector<1x1x8x8xbf16>
    tpu.vector_store %arg13[%c0_52, %c0_53, %c0_54, %c0_55], %67 {strides = array<i32>} : memref<1x4x8x8xbf16, #tpu.memory_space<vmem>>, vector<1x1x8x8xbf16>,
    %68 = vector.extract_strided_slice %62 {offsets = [0, 8], sizes = [8, 8], strides = [1, 1]} : vector<8x32xf32> to vector<8x8xf32>
    %69 = arith.truncf %68 : vector<8x8xf32> to vector<8x8xbf16>
    %c0_56 = arith.constant 0 : index
    %c1_57 = arith.constant 1 : index
    %c0_58 = arith.constant 0 : index
    %c0_59 = arith.constant 0 : index
    %70 = vector.load %arg13[%c0_56, %c1_57, %c0_58, %c0_59] : memref<1x4x8x8xbf16, #tpu.memory_space<vmem>>, vector<1x1x8x8xbf16>
    %71 = vector.shape_cast %70 : vector<1x1x8x8xbf16> to vector<8x8xbf16>
    %72 = vector.shape_cast %69 : vector<8x8xbf16> to vector<1x1x8x8xbf16>
    tpu.vector_store %arg13[%c0_56, %c1_57, %c0_58, %c0_59], %72 {strides = array<i32>} : memref<1x4x8x8xbf16, #tpu.memory_space<vmem>>, vector<1x1x8x8xbf16>,
    %73 = vector.extract_strided_slice %62 {offsets = [0, 16], sizes = [8, 8], strides = [1, 1]} : vector<8x32xf32> to vector<8x8xf32>
    %74 = arith.truncf %73 : vector<8x8xf32> to vector<8x8xbf16>
    %c0_60 = arith.constant 0 : index
    %c2_61 = arith.constant 2 : index
    %c0_62 = arith.constant 0 : index
    %c0_63 = arith.constant 0 : index
    %75 = vector.load %arg13[%c0_60, %c2_61, %c0_62, %c0_63] : memref<1x4x8x8xbf16, #tpu.memory_space<vmem>>, vector<1x1x8x8xbf16>
    %76 = vector.shape_cast %75 : vector<1x1x8x8xbf16> to vector<8x8xbf16>
    %77 = vector.shape_cast %74 : vector<8x8xbf16> to vector<1x1x8x8xbf16>
    tpu.vector_store %arg13[%c0_60, %c2_61, %c0_62, %c0_63], %77 {strides = array<i32>} : memref<1x4x8x8xbf16, #tpu.memory_space<vmem>>, vector<1x1x8x8xbf16>,
    %78 = vector.extract_strided_slice %62 {offsets = [0, 24], sizes = [8, 8], strides = [1, 1]} : vector<8x32xf32> to vector<8x8xf32>
    %79 = arith.truncf %78 : vector<8x8xf32> to vector<8x8xbf16>
    %c0_64 = arith.constant 0 : index
    %c3_65 = arith.constant 3 : index
    %c0_66 = arith.constant 0 : index
    %c0_67 = arith.constant 0 : index
    %80 = vector.load %arg13[%c0_64, %c3_65, %c0_66, %c0_67] : memref<1x4x8x8xbf16, #tpu.memory_space<vmem>>, vector<1x1x8x8xbf16>
    %81 = vector.shape_cast %80 : vector<1x1x8x8xbf16> to vector<8x8xbf16>
    %82 = vector.shape_cast %79 : vector<8x8xbf16> to vector<1x1x8x8xbf16>
    tpu.vector_store %arg13[%c0_64, %c3_65, %c0_66, %c0_67], %82 {strides = array<i32>} : memref<1x4x8x8xbf16, #tpu.memory_space<vmem>>, vector<1x1x8x8xbf16>,
    return
  }
  func.func @transform_0(%arg0: i32, %arg1: i32) -> (i32, i32, i32) {
    %c0_i32 = arith.constant 0 : i32
    %c0_i32_0 = arith.constant 0 : i32
    return %arg0, %arg1, %c0_i32 : i32, i32, i32
  }
  func.func @transform_1(%arg0: i32, %arg1: i32) -> (i32, i32, i32) {
    %c0_i32 = arith.constant 0 : i32
    %c0_i32_0 = arith.constant 0 : i32
    return %arg0, %arg1, %c0_i32 : i32, i32, i32
  }
  func.func @transform_2(%arg0: i32, %arg1: i32) -> (i32, i32, i32) {
    %c0_i32 = arith.constant 0 : i32
    %c0_i32_0 = arith.constant 0 : i32
    return %arg0, %arg1, %c0_i32 : i32, i32, i32
  }
  func.func @transform_3(%arg0: i32, %arg1: i32) -> (i32, i32) {
    %c0_i32 = arith.constant 0 : i32
    %c0_i32_0 = arith.constant 0 : i32
    %c0_i32_1 = arith.constant 0 : i32
    return %c0_i32, %c0_i32_0 : i32, i32
  }
  func.func @transform_4(%arg0: i32, %arg1: i32) -> (i32, i32) {
    %c0_i32 = arith.constant 0 : i32
    %c0_i32_0 = arith.constant 0 : i32
    %c0_i32_1 = arith.constant 0 : i32
    return %c0_i32, %c0_i32_0 : i32, i32
  }
  func.func @transform_5(%arg0: i32, %arg1: i32) -> (i32, i32) {
    %c0_i32 = arith.constant 0 : i32
    %c0_i32_0 = arith.constant 0 : i32
    %c0_i32_1 = arith.constant 0 : i32
    return %c0_i32, %c0_i32_0 : i32, i32
  }
  func.func @transform_6(%arg0: i32, %arg1: i32) -> (i32, i32) {
    %c0_i32 = arith.constant 0 : i32
    %c0_i32_0 = arith.constant 0 : i32
    %c0_i32_1 = arith.constant 0 : i32
    return %c0_i32, %c0_i32_0 : i32, i32
  }
  func.func @transform_7(%arg0: i32, %arg1: i32) -> (i32, i32) {
    %c0_i32 = arith.constant 0 : i32
    %c0_i32_0 = arith.constant 0 : i32
    %c0_i32_1 = arith.constant 0 : i32
    return %c0_i32, %c0_i32_0 : i32, i32
  }
  func.func @transform_8(%arg0: i32, %arg1: i32) -> (i32, i32) {
    %c0_i32 = arith.constant 0 : i32
    %c0_i32_0 = arith.constant 0 : i32
    %c0_i32_1 = arith.constant 0 : i32
    return %c0_i32, %c0_i32_0 : i32, i32
  }
  func.func @transform_9(%arg0: i32, %arg1: i32) -> (i32, i32, i32, i32) {
    %c0_i32 = arith.constant 0 : i32
    %c0_i32_0 = arith.constant 0 : i32
    %c0_i32_1 = arith.constant 0 : i32
    return %arg0, %c0_i32, %arg1, %c0_i32_0 : i32, i32, i32, i32
  }
  func.func @transform_10(%arg0: i32, %arg1: i32) -> (i32, i32, i32, i32) {
    %c0_i32 = arith.constant 0 : i32
    %c0_i32_0 = arith.constant 0 : i32
    %c0_i32_1 = arith.constant 0 : i32
    return %arg0, %c0_i32, %arg1, %c0_i32_0 : i32, i32, i32, i32
  }
  func.func @transform_11(%arg0: i32, %arg1: i32) -> (i32, i32, i32, i32) {
    %c0_i32 = arith.constant 0 : i32
    %c0_i32_0 = arith.constant 0 : i32
    %c0_i32_1 = arith.constant 0 : i32
    return %arg0, %c0_i32, %arg1, %c0_i32_0 : i32, i32, i32, i32
  }
}

</mosaic_0001>

<bundles_post_ra>
// kernel: tpu_custom_call.1
= control target key start
LH: loop header
LB: loop body
LE: loop exit
PB: predicated region body
PF: predicated region fallthrough
CT: control target
= control target key end

     0   :  { %s2106_s0 = inlined_call_operand.hbm [shape: bf16[2,8,32], index: 0, kind: input, shape index: {}]   ;;  %s2107_s1 = inlined_call_operand.hbm [shape: bf16[2,8,32], index: 1, kind: input, shape index: {}]   ;;  %s2108_s2 = inlined_call_operand.hbm [shape: bf16[2,8,32], index: 2, kind: input, shape index: {}]   ;;  %s2109_s3 = inlined_call_operand.hbm [shape: bf16[32,32], index: 3, kind: input, shape index: {}]   ;;  %s2110_s4 = inlined_call_operand.hbm [shape: bf16[32,32], index: 4, kind: input, shape index: {}]   ;;  %s2111_s5 = inlined_call_operand.hbm [shape: bf16[32,32], index: 5, kind: input, shape index: {}]   ;;  %s2112_s6 = inlined_call_operand.vmem [shape: f32[1,32], index: 6, kind: input, shape index: {}]   ;;  %s2113_s7 = inlined_call_operand.vmem [shape: f32[1,32], index: 7, kind: input, shape index: {}]   ;;  %s2114_s8 = inlined_call_operand.vmem [shape: f32[1,32], index: 8, kind: input, shape index: {}]   ;;  %s2115_s9 = inlined_call_operand.hbm [shape: bf16[2,4,8,8], index: 9, kind: output, shape index: {0}]   ;;  %s2116_s10 = inlined_call_operand.hbm [shape: bf16[2,4,8,8], index: 10, kind: output, shape index: {1}]   ;;  %s2117_s11 = inlined_call_operand.hbm [shape: bf16[2,4,8,8], index: 11, kind: output, shape index: {2}]  }
   0x1   :  { %2139 = sst [smem:[#allocation29_spill]] %s2107_s1 }
   0x2   :  { %2140 = sst [smem:[#allocation30_spill]] %s2109_s3 }
   0x3   :  { %2141 = sst [smem:[#allocation31_spill]] %s2110_s4 }
   0x4   :  { %2142 = sst [smem:[#allocation32_spill]] %s2115_s9 }
   0x5   :  { %2143 = sst [smem:[#allocation33_spill]] %s2116_s10 }
   0x6   :  { %2144 = sst [smem:[#allocation34_spill]] %s2117_s11 }
   0x7   :  { %17 = vsyncpa [#allocation3], 0 }
   0x8   :  { %19 = vsyncpa [#allocation3 + $0x1], 0 }
   0x9   :  { %20 = vsyncpa [#allocation6], 0 }
   0xa   :  { %22 = vsyncpa [#allocation6 + $0x1], 0 }
   0xb   :  { %23 = vsyncpa [#allocation9], 0 }
   0xc   :  { %24 = vsyncpa [#allocation12], 0 }
   0xd   :  { %25 = vsyncpa [#allocation4], 0 }
   0xe   :  { %27 = vsyncpa [#allocation4 + $0x1], 0 }
   0xf   :  { %28 = vsyncpa [#allocation15], 0 }
  0x10   :  { %30 = vsyncpa [#allocation15 + $0x1], 0  ;;  %s1724_s17 = smov 0   ;;  %s1726_s18 = smov 0  }
  0x11   :  { %s1728_s19 = smov 0   ;;  %s1730_s20 = smov 0  }
  0x12   :  { %s1732_s21 = smov 0   ;;  %s1734_s22 = smov 0  }
  0x13 LB: > { %2145 = sst [smem:[#allocation23_spill]] %s1624_s17  ;;  %s1755_s23 = sadd.s32 4294967295, %s1644_s22   ;;  %s1644_s22 = sphi %s1734_s22, %s36_s22   ;;  %s1640_s21 = sphi %s1732_s21, %s2186_s21   ;;  %s1636_s20 = sphi %s1730_s20, %s2190_s20   ;;  %s1632_s19 = sphi %s1728_s19, %s2189_s19   ;;  %s1628_s18 = sphi %s1726_s18, %s2188_s18   ;;  %s1624_s17 = sphi %s1724_s17, %s2187_s17  }
  0x14   : > { %2146 = sst [smem:[#allocation24_spill]] %s1640_s21  ;;  %s2118_s24 = sadd.s32 4294967294, %s1644_s22  }
  0x15   : > { %2147 = sst [smem:[#allocation25_spill]] %s1644_s22  ;;  %p70_p0 = scmp.ne.s32.totalorder %s1628_s18, %s1624_s17 }
  0x16   : > { %p2133_p1 = scmp.eq.s32.totalorder %s1755_s23, 0  ;;  %p284_p3 = scmp.eq.s32.totalorder %s2118_s24, 1 }
  0x17   : > { %p1111_p5 = scmp.ge.s32.totalorder %s1644_s22, 1  ;;  %p347_p7 = scmp.lt.s32.totalorder %s1644_s22, 3 }
  0x18   : > { %p1766_p4 = por %p2133_p1, %p70_p0  ;;  %p1771_p6 = por %p284_p3, %p70_p0 }
  0x19   : > { %p1776_p8 = pnand %p1111_p5, %p347_p7  ;;  %s1646_s28 = smov [#allocation8]  }
  0x1a   : > { %s2148_s25 = scalar_select %p1766_p4, 1, 0 }
  0x1b   : > { %s2149_s26 = scalar_select %p1771_p6, 1, 0 }
  0x1c   : > { %s2151_s27 = scalar_select %p1776_p8, 1, 0 }
  0x1d   : > { %2150 = sst [smem:[#allocation26_spill]] %s2149_s26  ;;  %s359_s29 = sshll.u32 %s1646_s28, 4  ;;  %s360_s29 = int_to_ptr.vmem [resolvable:$true] %s359_s29 }
  0x1e   : > { %p1230_p9 = pneg %p1776_p8  ;;  %s48_s12 = sadd.s32 1, %s1640_s21 }
  0x1f   : > { %s1345_s13 = scalar_lea.vmem %s360_s29, 256  ;;  %p1353_p5 = scmp.lt.s32.totalorder %s360_s29, %s360_s29 }
  0x20   : > { %p1785_p11 = pnand %p1230_p9, %p2133_p1  ;;  %p1346_p13 = scmp.ne.s32.totalorder %s360_s29, %s1345_s13 }
  0x21   : > { %p1354_p7 = scmp.lt.s32.totalorder %s1345_s13, %s1345_s13 }
  0x22   : > { %p2134_p12 = pneg %p1785_p11 }
  0x23   : > { %p1355_p2 = por %p1354_p7, %p1353_p5 }
  0x24   : > { %p1348_p0 = pnand %p1346_p13, %p2134_p12 }
  0x26   : > { %p1349_p3 = pneg %p1348_p0 }
  0x28   : > { %p1356_p10 = pnand %p1355_p2, %p1349_p3 }
  0x2a   : > { %1359 = shalt.err (!%p1356_p10)
}
  0x2b   : > { %s2121_s14 = smov 64   ;;  %s2123_s15 = smov 4  }
  0x2c   : > { %s2153_s3 = sld [smem:[#allocation30_spill]]  ;;  %p50_p2 = scmp.ge.s32.totalorder %s48_s12, 2 }
  0x2d   : > { %s57_s13 = sadd.s32 1, %s1632_s19  ;;  %p64_p9 = scmp.ne.s32.totalorder %s1632_s19, %s1628_s18 }
  0x2e   : > { %p65_p10 = scmp.eq.s32.totalorder %s1644_s22, 0  ;;  %s2192_s12 = smov (%p50_p2, %s48_s12), 0 }
  0x2f   : > { %2154 = sst [smem:[#allocation27_spill]] %s2192_s12  ;;  %p2155_p0 = scmp.eq.s32.totalorder %s1755_s23, 1 }
  0x30   : > { %p66_p13 = por %p65_p10, %p64_p9  ;;  %s52_s26 = ssub.s32 %s1640_s21, %s2192_s12 }
  0x31   : > { %p1811_p3 = por %p2155_p0, %p64_p9  ;;  %p1263_p5 = scmp.lt.s32.totalorder %s1644_s22, 2 }
  0x32   : > { %1233 = dma.hbm_to_vmem [thread:$0]  (!%p1785_p11), %s2153_s3, 256, %s360_s29, [#allocation9], %s2121_s14, %s2121_s14, %s2123_s15  }
  0x33   : > { %s2156_s24 = scalar_select %p1811_p3, 1, 0 }
  0x34   : > { %p55_p7 = scmp.eq.s32.totalorder %s52_s26, 0  ;;  %s2127_s17 = sand.u32 1, %s1632_s19  }
  0x35   : > { %s1821_s29 = sshll.u32 %s2127_s17, 2  ;;  %s1824_s16 = sshll.u32 %s1640_s21, 6 }
  0x36   : > { %s1827_s28 = scalar_select %p55_p7, %s1632_s19, %s57_s13  }
  0x37   : > { %p1829_p2 = pnand %p1263_p5, %p66_p13  ;;  %s427_s15 = sand.u32 1, %s1644_s22  }
  0x38   : > { %2157 = sst [smem:[#allocation28_spill]] %s1827_s28  ;;  %s431_s11 = scalar_lea.vmem [#allocation5], %s1821_s29 }
  0x39   : > { %s2159_s1 = sld [smem:[#allocation29_spill]]  ;;  %s439_s17 = sshll.u32 %s431_s11, 4  ;;  %s440_s17 = int_to_ptr.vmem [resolvable:$true] %s439_s17 }
  0x3a   : > { %s1649_s9 = smov [#allocation10]   ;;  %s1839_s10 = scalar_lea.sflag [#allocation6], %s427_s15 }
  0x3b   : > { %s372_s21 = sshll.u32 %s1649_s9, 4  ;;  %p2135_p9 = pneg %p1829_p2  ;;  %s373_s21 = int_to_ptr.vmem [resolvable:$true] %s372_s21 }
  0x3c   : > { %s1373_s13 = scalar_lea.vmem %s440_s17, 64  ;;  %s1650_s28 = smov [#allocation5]  }
  0x3d   : > { %p1374_p10 = scmp.ne.s32.totalorder %s440_s17, %s1373_s13  ;;  %s1378_s22 = sshll.u32 %s1650_s28, 4  ;;  %s1379_s22 = int_to_ptr.vmem [resolvable:$false] %s1378_s22 }
  0x3e   : > { %s1380_s3 = scalar_lea.vmem %s1379_s22, 128  ;;  %p1381_p5 = scmp.lt.s32.totalorder %s440_s17, %s1379_s22 }
  0x3f   : > { %s437_s26 = scalar_lea.hbm %s2159_s1, %s1824_s16  ;;  %p1376_p13 = pnand %p1374_p10, %p2135_p9 }
  0x40   : > { %p1382_p7 = scmp.lt.s32.totalorder %s1380_s3, %s1373_s13 }
  0x41   : > { %p1377_p0 = pneg %p1376_p13 }
  0x42   : > { %p1383_p1 = por %p1382_p7, %p1381_p5 }
  0x44   : > { %p1384_p12 = pnand %p1383_p1, %p1377_p0 }
  0x46   : > { %1387 = shalt.err (!%p1384_p12)
}
  0x47   : > { %1246 = dma.hbm_to_vmem [thread:$0]  (!%p1829_p2), %s437_s26, 64, %s440_s17, %s1839_s10  }
  0x48   : > { %s1399_s9 = scalar_lea.vmem %s373_s21, 256  ;;  %p2160_p10 = pneg %p1785_p11 }
  0x49   : > { %p1400_p6 = scmp.ne.s32.totalorder %s373_s21, %s1399_s9  ;;  %p1407_p3 = scmp.lt.s32.totalorder %s373_s21, %s373_s21 }
  0x4a   : > { %p1408_p4 = scmp.lt.s32.totalorder %s1399_s9, %s1399_s9 }
  0x4b   : > { %p1402_p13 = pnand %p1400_p6, %p2160_p10 }
  0x4c   : > { %p1409_p8 = por %p1408_p4, %p1407_p3 }
  0x4d   : > { %p1403_p9 = pneg %p1402_p13 }
  0x4f   : > { %p1410_p5 = pnand %p1409_p8, %p1403_p9 }
  0x51   : > { %1413 = shalt.err (!%p1410_p5)
}
  0x52   : > { %s2161_s11 = smov 4   ;;  %s2162_s22 = smov 64  }
  0x53   : > { %s2163_s4 = sld [smem:[#allocation31_spill]]  ;;  %s1651_s17 = smov [#allocation11]  }
  0x54   : > { %s385_s28 = sshll.u32 %s1651_s17, 4  ;;  %p2164_p6 = pmov %p2160_p10  ;;  %s386_s28 = int_to_ptr.vmem [resolvable:$true] %s385_s28 }
  0x55   : > { %s1425_s26 = scalar_lea.vmem %s386_s28, 256  ;;  %p1433_p12 = scmp.lt.s32.totalorder %s386_s28, %s386_s28 }
  0x56   : > { %p1426_p1 = scmp.ne.s32.totalorder %s386_s28, %s1425_s26  ;;  %p1434_p3 = scmp.lt.s32.totalorder %s1425_s26, %s1425_s26 }
  0x58   : > { %p1428_p4 = pnand %p1426_p1, %p2164_p6  ;;  %p1435_p9 = por %p1434_p3, %p1433_p12 }
  0x59   : > { %1236 = dma.hbm_to_vmem [thread:$0]  (!%p1785_p11), %s2163_s4, 256, %s373_s21, [#allocation9], %s2162_s22, %s2162_s22, %s2161_s11  }
  0x5a   : > { %p1429_p8 = pneg %p1428_p4 }
  0x5c   : > { %p1436_p0 = pnand %p1435_p9, %p1429_p8 }
  0x5e   : > { %1439 = shalt.err (!%p1436_p0)
}
  0x5f   : > { %1239 = dma.hbm_to_vmem [thread:$0]  (!%p1785_p11), %s2111_s5, 256, %s386_s28, [#allocation12], %s2162_s22, %s2162_s22, %s2161_s11  }
  0x60   : > { %s418_s12 = scalar_lea.hbm %s2106_s0, %s1824_s16  ;;  %s412_s15 = scalar_lea.vmem [#allocation2], %s1821_s29 }
  0x61   : > { %s420_s17 = sshll.u32 %s412_s15, 4  ;;  %s2165_s26 = sand.u32 1, %s1632_s19   ;;  %s421_s17 = int_to_ptr.vmem [resolvable:$true] %s420_s17 }
  0x62   : > { %s409_s30 = scalar_lea.sflag [#allocation3], %s2165_s26  ;;  %s1453_s1 = scalar_lea.vmem %s421_s17, 64 }
  0x63   : > { %p1454_p7 = scmp.ne.s32.totalorder %s421_s17, %s1453_s1  ;;  %p2166_p10 = pneg %p1829_p2 }
  0x64   : > { %s1652_s21 = smov [#allocation2]  }
  0x65   : > { %p1456_p13 = pnand %p1454_p7, %p2166_p10  ;;  %s1458_s13 = sshll.u32 %s1652_s21, 4  ;;  %s1459_s13 = int_to_ptr.vmem [resolvable:$false] %s1458_s13 }
  0x66   : > { %s1460_s4 = scalar_lea.vmem %s1459_s13, 128  ;;  %p1461_p11 = scmp.lt.s32.totalorder %s421_s17, %s1459_s13 }
  0x67   : > { %p1457_p5 = pneg %p1456_p13  ;;  %p1462_p1 = scmp.lt.s32.totalorder %s1460_s4, %s1453_s1 }
  0x69   : > { %p1463_p6 = por %p1462_p1, %p1461_p11 }
  0x6b   : > { %p1464_p4 = pnand %p1463_p6, %p1457_p5 }
  0x6d   : > { %1467 = shalt.err (!%p1464_p4)
}
  0x6e   : > { %1243 = dma.hbm_to_vmem [thread:$0]  (!%p1829_p2), %s418_s12, 64, %s421_s17, %s409_s30  }
  0x6f   : > { %s456_s28 = scalar_lea.hbm %s2108_s2, %s1824_s16  ;;  %s450_s3 = scalar_lea.vmem [#allocation7], %s1821_s29 }
  0x70   : > { %s458_s9 = sshll.u32 %s450_s3, 4  ;;  %p2167_p12 = pmov %p2166_p10  ;;  %s459_s9 = int_to_ptr.vmem [resolvable:$true] %s458_s9 }
  0x71   : > { %s1481_s15 = scalar_lea.vmem %s459_s9, 64  ;;  %s1653_s1 = smov [#allocation7]  }
  0x72   : > { %p1482_p8 = scmp.ne.s32.totalorder %s459_s9, %s1481_s15  ;;  %s1486_s4 = sshll.u32 %s1653_s1, 4  ;;  %s1487_s4 = int_to_ptr.vmem [resolvable:$false] %s1486_s4 }
  0x73   : > { %s1488_s26 = scalar_lea.vmem %s1487_s4, 128  ;;  %p1489_p0 = scmp.lt.s32.totalorder %s459_s9, %s1487_s4 }
  0x74   : > { %p1484_p3 = pnand %p1482_p8, %p2167_p12  ;;  %p1490_p7 = scmp.lt.s32.totalorder %s1488_s26, %s1481_s15 }
  0x76   : > { %p1485_p9 = pneg %p1484_p3  ;;  %p1491_p10 = por %p1490_p7, %p1489_p0 }
  0x78   : > { %p1492_p13 = pnand %p1491_p10, %p1485_p9 }
  0x7a   : > { %1495 = shalt.err (!%p1492_p13)
}
  0x7b   : > { %1249 = dma.hbm_to_vmem [thread:$0]  (!%p1829_p2), %s456_s28, 64, %s459_s9, %s1839_s10  }
  0x7c   : > { %p2168_p5 = scmp.ne.s32.totalorder %s2151_s27, 0 }
  0x7d   : > { %s1897_s29 = sand.u32 (!%p2168_p5), 1, %s1628_s18   ;;  %p2169_p11 = scmp.ne.s32.totalorder (!%p2168_p5), %s2148_s25, 0 }
  0x7e   : > { %467 = sbr.rel (%p2168_p5) target bundleno = 528 (0x210), region = 56  ;;  %s1900_s16 = sshll.u32 (!%p2168_p5), %s1897_s29, 2 }
  0x7f   : > { %s470_s12 = scalar_lea.sflag (!%p2168_p5), [#allocation3], %s1897_s29  ;;  %s473_s17 = scalar_lea.vmem (!%p2168_p5), [#allocation2], %s1900_s16 }
  0x83   : > { %1599 = dma.done.wait (%p2169_p11), %s470_s12, 64  }
  0x84   : > { %1601 = vsyncadd (%p2169_p11), %s470_s12, 4294967232  ;;  %s478_s10 = sand.u32 1, %s1755_s23   ;;  %s482_s14 = scalar_lea.vmem [#allocation5], %s1900_s16 }
  0x85   : > { %s479_s27 = scalar_lea.sflag [#allocation6], %s478_s10 }
  0x86   : > { %1603 = dma.done.wait (%p2169_p11), %s479_s27, 128  }
  0x87   : > { %1605 = vsyncadd (%p2169_p11), %s479_s27, 4294967168  ;;  %s491_s30 = scalar_lea.vmem [#allocation7], %s1900_s16  ;;  %p2170_p2 = scmp.eq.s32.totalorder %s1755_s23, 0 }
  0x89   : > { %1607 = dma.done.wait (%p2170_p2), [#allocation9], 512   ;;  %p2171_p1 = pmov %p2170_p2 }
  0x8b   : > { %1609 = vsyncadd (%p2171_p1), [#allocation9], 4294966784  ;;  %p2172_p6 = pmov %p2171_p1 }
  0x8c   : > { %p2173_p4 = pmov %p2171_p1 }
  0x8d   : > { %1611 = dma.done.wait (%p2172_p6), [#allocation12], 256  }
  0x8e   : > { %1613 = vsyncadd (%p2173_p4), [#allocation12], 4294967040  ;;  %v1654_v0 = vmov 0.0   ;;  %vm1655_vm0 = vmmov 0   ;;  %v1328_v1 = vld [vmem:[#allocation8 + $0x8] sm:$0xff]   ;;  %v1329_v2 = vld [vmem:[#allocation10 + $0x8] sm:$0xff]  }
  0x8f   : > { %1182 = vmatprep.subr.bf16.mxu0 %v1654_v0  ;;  %1190 = vmatprep.subr.bf16.mxu1 %v1654_v0  ;;  %v1330_v3 = vld [vmem:[#allocation8] sm:$0xff]   ;;  %v1331_v4 = vld [vmem:[#allocation10] sm:$0xff]   ;;  %v563_v5 = vld [vmem:[%s473_s17] sm:$0xf]  ;;  %vm587_vm1 = vcmask 261120   ;;  %s1934_s13 = sshll.u32 %s1897_s29, 4 }
  0x90   : > { %1186 = vmatprep.mubr.msk.bf16.mxu0 %vm1655_vm0, %v1654_v0  ;;  %1194 = vmatprep.mubr.msk.bf16.mxu1 %vm1655_vm0, %v1654_v0  ;;  %v1332_v6 = vld [vmem:[#allocation11 + $0x8] sm:$0xff]   ;;  %v653_v7 = vld [vmem:[%s482_s14] sm:$0xf]  ;;  %v1333_v8 = vld [vmem:[#allocation11] sm:$0xff]   ;;  %vm633_vm2 = vcmask 60416   ;;  %s1940_s28 = scalar_lea.vmem [#allocation14], %s1934_s13 }
  0x91   : > { %1183 = vmatpush3.bf16.msra.mxu0 %v1328_v1  ;;  %1191 = vmatpush3.bf16.msra.mxu1 %v1329_v2  ;;  %v740_v9 = vld [vmem:[%s491_s30] sm:$0xf]  ;;  %v1132_v10 = vld [vmem:[%s2112_s6] ss:$0 sm:$0xff]  ;;  %s1656_s3 = smov 104   ;;  %s1657_s9 = smov 120  }
  0x92   : > { %1184 = vmatprep.subr.bf16.mxu0 %v1654_v0  ;;  %1192 = vmatprep.subr.bf16.mxu1 %v1654_v0  ;;  %v1140_v11 = vld [vmem:[%s2113_s7] ss:$0 sm:$0xff]  ;;  %s1948_s4 = scalar_lea.vmem [#allocation13], %s1934_s13  ;;  %s1658_s26 = smov 112  }
  0x93   : > { %v1148_v24 = vld [vmem:[%s2114_s8] ss:$0 sm:$0xff]  ;;  %s1953_s16 = scalar_lea.vmem [#allocation16], %s1934_s13  ;;  %s869_s12 = sshll.u32 %s1940_s28, 4  ;;  %s1962_s12 = int_to_ptr.vmem [resolvable:$true] %s869_s12 }
  0x94   : > { %s1959_s17 = sshll.u32 %s1636_s20, 8  ;;  %s852_s27 = sshll.u32 %s1948_s4, 4  ;;  %s1974_s27 = int_to_ptr.vmem [resolvable:$true] %s852_s27 }
  0x95   : > { %1185 = vmatpush3.bf16.msra.mxu0 %v1330_v3  ;;  %1193 = vmatpush3.bf16.msra.mxu1 %v1331_v4  ;;  %s2174_s25 = sld [smem:[#allocation33_spill]]  ;;  %s1982_s20 = scalar_lea.sflag [#allocation15], %s478_s10 }
  0x96   : > { %1198 = vmatprep.subr.bf16.mxu0 %v1654_v0  ;;  %s1496_s13 = scalar_lea.vmem %s1962_s12, 256  ;;  %p2175_p12 = scmp.ne.s32.totalorder %s2156_s24, 0 }
  0x97   : > { %p1497_p8 = scmp.ne.s32.totalorder %s1962_s12, %s1496_s13  ;;  %s1659_s11 = smov [#allocation14]  }
  0x98   : > { %1187 = vmatmul.mubr.msk.bf16.vlgmr.msra.gmra.mxu0 %vm587_vm1, %v563_v5  ;;  %1195 = vmatmul.mubr.msk.bf16.vlgmr.msra.gmra.mxu1 %vm587_vm1, %v653_v7  ;;  %s1500_s22 = sshll.u32 %s1659_s11, 4  ;;  %s1501_s22 = int_to_ptr.vmem [resolvable:$false] %s1500_s22 }
  0x99   : > { %1199 = vmatpush3.bf16.msra.mxu0 %v1332_v6  ;;  %1202 = vmatprep.mubr.msk.bf16.mxu0 %vm1655_vm0, %v1654_v0  ;;  %p1498_p3 = pnand %p1497_p8, %p2175_p12  ;;  %p1503_p0 = scmp.lt.s32.totalorder %s1962_s12, %s1501_s22 }
  0x9a   : > { %1200 = vmatprep.subr.bf16.mxu0 %v1654_v0 }
  0x9b   : > { %s1972_s21 = scalar_lea.hbm %s2174_s25, %s1959_s17  ;;  %p1499_p9 = pneg %p1498_p3 }
  0x9d   : > { %1201 = vmatpush3.bf16.msra.mxu0 %v1333_v8 }
  0xa0   : > { %1203 = vmatmul.mubr.msk.bf16.vlgmr.msra.gmra.mxu0 %vm587_vm1, %v740_v9 }
 0x158   : > { %v625_v12 = vpop.f32.mrf.mxu0  ;;  %v714_v14 = vpop.f32.mrf.mxu1 }
 0x159   : > { %v626_v13 = vadd.f32 %v1132_v10, %v625_v12  ;;  %v715_v15 = vadd.f32 %v1140_v11, %v714_v14 }
 0x15a   : > { %v1188_v16 = vpop.f32.mrf.mxu0  ;;  %v1196_v18 = vpop.f32.mrf.mxu1 }
 0x15b   : > { %v631_v17 = vmul.f32 0.35355338, %v626_v13  ;;  %v720_v19 = vpack.c.bf16 %v715_v15, %v715_v15 }
 0x15c   : > { %v628_v20 = vpop.f32.mrf.mxu0  ;;  %v717_v22 = vpop.f32.mrf.mxu1 }
 0x15d   : > { %v632_v21 = vpack.c.bf16 %v631_v17, %v631_v17  ;;  %721 = vst.msk [vmem:[%s1940_s28] sm:$0xf] %vm633_vm2, %v720_v19  ;;  %735 = vrot.lane.b32.xlu1 %v720_v19, %s1656_s3  ;;  %725 = vrot.lane.b32.xlu0 %v720_v19, %s1657_s9 }
 0x15e   : > { %v1189_v23 = vpop.f32.mrf.mxu0  ;;  %v1197_v25 = vpop.f32.mrf.mxu1 }
 0x15f   : > { %634 = vst.msk [vmem:[%s1948_s4] sm:$0xf] %vm633_vm2, %v632_v21 }
 0x160   : > { %v801_v26 = vpop.f32.mrf.mxu0 }
 0x161   : > { %v802_v27 = vadd.f32 %v1148_v24, %v801_v26  ;;  %730 = vrot.lane.b32.xlu0 %v720_v19, %s1658_s26  ;;  %638 = vrot.lane.b32.xlu1 %v632_v21, %s1657_s9 }
 0x162   : > { %v1204_v28 = vpop.f32.mrf.mxu0 }
 0x163   : > { %v807_v29 = vpack.c.bf16 %v802_v27, %v802_v27 }
 0x164   : > { %v804_v30 = vpop.f32.mrf.mxu0 }
 0x165   : > { %808 = vst.msk [vmem:[%s1953_s16] sm:$0xf] %vm633_vm2, %v807_v29  ;;  %643 = vrot.lane.b32.xlu0 %v632_v21, %s1658_s26  ;;  %648 = vrot.lane.b32.xlu1 %v632_v21, %s1656_s3 }
 0x166   : > { %v1205_v31 = vpop.f32.mrf.mxu0 }
 0x169   : > { %817 = vrot.lane.b32.xlu1 %v807_v29, %s1658_s26  ;;  %812 = vrot.lane.b32.xlu0 %v807_v29, %s1657_s9 }
 0x16d   : > { %822 = vrot.lane.b32.xlu0 %v807_v29, %s1656_s3  ;;  %s1502_s3 = scalar_lea.vmem %s1501_s22, 512 }
 0x16e   : > { %p1504_p7 = scmp.lt.s32.totalorder %s1502_s3, %s1496_s13 }
 0x170   : > { %p1505_p10 = por %p1504_p7, %p1503_p0 }
 0x172   : > { %p1506_p13 = pnand %p1505_p10, %p1499_p9 }
 0x1cf   : > { %v736_v32 = vpop.permute.xlu1 %735  ;;  %v726_v33 = vpop.permute.xlu0 %725 }
 0x1d0   : > { %1147 = vst.msk [vmem:[%s1940_s28 + $0xc] sm:$0xf] %vm633_vm2, %v736_v32  ;;  %1145 = vst.msk [vmem:[%s1940_s28 + $0x4] sm:$0xf] %vm633_vm2, %v726_v33 }
 0x1d3   : > { %v731_v34 = vpop.permute.xlu0 %730  ;;  %v639_v35 = vpop.permute.xlu1 %638 }
 0x1d4   : > { %1146 = vst.msk [vmem:[%s1940_s28 + $0x8] sm:$0xf] %vm633_vm2, %v731_v34  ;;  %1137 = vst.msk [vmem:[%s1948_s4 + $0x4] sm:$0xf] %vm633_vm2, %v639_v35 }
 0x1d5   : > { %1509 = shalt.err (!%p1506_p13)
}
 0x1d6   : > { %s1510_s23 = scalar_lea.hbm %s1972_s21, 256  ;;  %s1514_s9 = scalar_lea.hbm %s2174_s25, 512 }
 0x1d7   : > { %p1511_p5 = scmp.ne.s32.totalorder %s1972_s21, %s1510_s23  ;;  %p1515_p1 = scmp.lt.s32.totalorder %s1972_s21, %s2174_s25 }
 0x1d8   : > { %p1516_p6 = scmp.lt.s32.totalorder %s1514_s9, %s1510_s23 }
 0x1d9   : > { %p1512_p11 = pnand %p1511_p5, %p2175_p12 }
 0x1da   : > { %p1517_p4 = por %p1516_p6, %p1515_p1 }
 0x1db   : > { %p1513_p2 = pneg %p1512_p11 }
 0x1dd   : > { %p1518_p8 = pnand %p1517_p4, %p1513_p2 }
 0x1df   : > { %1521 = shalt.err (!%p1518_p8)
}
 0x1e0   : > { %s1660_s26 = smov 64   ;;  %s1661_s14 = smov 4   ;;  %v644_v36 = vpop.permute.xlu0 %643  ;;  %v649_v37 = vpop.permute.xlu1 %648 }
 0x1e1   : > { %1225 = dma.vmem_to_hbm [thread:$0]  (%p2175_p12), %s1962_s12, 256, %s1972_s21, %s1982_s20, %s1660_s26, %s1660_s26, %s1661_s14  }
 0x1e2   : > { %s2176_s11 = sld [smem:[#allocation32_spill]]  ;;  %1138 = vst.msk [vmem:[%s1948_s4 + $0x8] sm:$0xf] %vm633_vm2, %v644_v36  ;;  %1139 = vst.msk [vmem:[%s1948_s4 + $0xc] sm:$0xf] %vm633_vm2, %v649_v37  ;;  %s828_s3 = scalar_lea.sflag [#allocation4], %s1897_s29 }
 0x1e3   : > { %s1522_s23 = scalar_lea.vmem %s1974_s27, 256  ;;  %s1662_s10 = smov [#allocation13]  }
 0x1e4   : > { %p1523_p3 = scmp.ne.s32.totalorder %s1974_s27, %s1522_s23  ;;  %s1526_s28 = sshll.u32 %s1662_s10, 4  ;;  %s1527_s28 = int_to_ptr.vmem [resolvable:$false] %s1526_s28 }
 0x1e5   : > { %s1528_s12 = scalar_lea.vmem %s1527_s28, 512  ;;  %p1529_p7 = scmp.lt.s32.totalorder %s1974_s27, %s1527_s28 }
 0x1e6   : > { %p1524_p9 = pnand %p1523_p3, %p2175_p12  ;;  %p1530_p10 = scmp.lt.s32.totalorder %s1528_s12, %s1522_s23 }
 0x1e8   : > { %s2012_s22 = scalar_lea.hbm %s2176_s11, %s1959_s17  ;;  %p1525_p0 = pneg %p1524_p9 }
 0x1e9   : > { %p1531_p13 = por %p1530_p10, %p1529_p7 }
 0x1eb   : > { %p1532_p5 = pnand %p1531_p13, %p1525_p0 }
 0x1ed   : > { %1535 = shalt.err (!%p1532_p5)
}
 0x1ee   : > { %s1536_s4 = scalar_lea.hbm %s2012_s22, 256  ;;  %s1540_s9 = scalar_lea.hbm %s2176_s11, 512 }
 0x1ef   : > { %p1537_p11 = scmp.ne.s32.totalorder %s2012_s22, %s1536_s4  ;;  %p1541_p6 = scmp.lt.s32.totalorder %s2012_s22, %s2176_s11 }
 0x1f0   : > { %p1542_p4 = scmp.lt.s32.totalorder %s1540_s9, %s1536_s4 }
 0x1f1   : > { %p1538_p2 = pnand %p1537_p11, %p2175_p12 }
 0x1f2   : > { %p1543_p8 = por %p1542_p4, %p1541_p6 }
 0x1f3   : > { %p1539_p1 = pneg %p1538_p2 }
 0x1f5   : > { %p1544_p3 = pnand %p1543_p8, %p1539_p1 }
 0x1f7   : > { %1547 = shalt.err (!%p1544_p3)
}
 0x1f8   : > { %1224 = dma.vmem_to_hbm [thread:$0]  (%p2175_p12), %s1974_s27, 256, %s2012_s22, %s828_s3, %s1660_s26, %s1660_s26, %s1661_s14   ;;  %v818_v38 = vpop.permute.xlu1 %817  ;;  %v813_v39 = vpop.permute.xlu0 %812 }
 0x1f9   : > { %s886_s30 = sshll.u32 %s1953_s16, 4  ;;  %1154 = vst.msk [vmem:[%s1953_s16 + $0x8] sm:$0xf] %vm633_vm2, %v818_v38  ;;  %1153 = vst.msk [vmem:[%s1953_s16 + $0x4] sm:$0xf] %vm633_vm2, %v813_v39  ;;  %s2177_s10 = sld [smem:[#allocation34_spill]]  ;;  %s2047_s30 = int_to_ptr.vmem [resolvable:$true] %s886_s30 }
 0x1fa   : > { %s1548_s27 = scalar_lea.vmem %s2047_s30, 256  ;;  %s1663_s22 = smov [#allocation16]  }
 0x1fb   : > { %p1549_p9 = scmp.ne.s32.totalorder %s2047_s30, %s1548_s27  ;;  %s1552_s3 = sshll.u32 %s1663_s22, 4  ;;  %s1553_s3 = int_to_ptr.vmem [resolvable:$false] %s1552_s3 }
 0x1fc   : > { %v823_v40 = vpop.permute.xlu0 %822  ;;  %s1554_s12 = scalar_lea.vmem %s1553_s3, 512  ;;  %p1555_p10 = scmp.lt.s32.totalorder %s2047_s30, %s1553_s3 }
 0x1fd   : > { %1155 = vst.msk [vmem:[%s1953_s16 + $0xc] sm:$0xf] %vm633_vm2, %v823_v40  ;;  %p1550_p0 = pnand %p1549_p9, %p2175_p12  ;;  %p1556_p13 = scmp.lt.s32.totalorder %s1554_s12, %s1548_s27 }
 0x1ff   : > { %s2053_s28 = scalar_lea.hbm %s2177_s10, %s1959_s17  ;;  %p1551_p7 = pneg %p1550_p0 }
 0x200   : > { %p1557_p5 = por %p1556_p13, %p1555_p10 }
 0x202   : > { %p1558_p11 = pnand %p1557_p5, %p1551_p7 }
 0x204   : > { %1561 = shalt.err (!%p1558_p11)
}
 0x205   : > { %s1562_s17 = scalar_lea.hbm %s2053_s28, 256  ;;  %s1566_s29 = scalar_lea.hbm %s2177_s10, 512 }
 0x206   : > { %p1563_p2 = scmp.ne.s32.totalorder %s2053_s28, %s1562_s17  ;;  %p1567_p4 = scmp.lt.s32.totalorder %s2053_s28, %s2177_s10 }
 0x207   : > { %p1568_p8 = scmp.lt.s32.totalorder %s1566_s29, %s1562_s17 }
 0x208   : > { %p1564_p1 = pnand %p1563_p2, %p2175_p12 }
 0x209   : > { %p1569_p3 = por %p1568_p8, %p1567_p4 }
 0x20a   : > { %p1565_p6 = pneg %p1564_p1 }
 0x20c   : > { %p1570_p9 = pnand %p1569_p3, %p1565_p6 }
 0x20e   : > { %1573 = shalt.err (!%p1570_p9)
}
 0x20f   : > { %1226 = dma.vmem_to_hbm [thread:$0]  (%p2175_p12), %s2047_s30, 256, %s2053_s28, %s1982_s20, %s1660_s26, %s1660_s26, %s1661_s14  }
 0x210 PF: > { %s2178_s15 = sld [smem:[#allocation23_spill]] }
 0x211   : > { %s2179_s1 = sld [smem:[#allocation26_spill]] }
 0x212   : > { %s2180_s13 = sld [smem:[#allocation25_spill]] }
 0x216   : > { %s901_s23 = sand.u32 1, %s2178_s15  }
 0x217   : > { %p2181_p0 = scmp.ne.s32.totalorder %s2179_s1, 0  ;;  %s902_s27 = scalar_lea.sflag [#allocation4], %s901_s23 }
 0x218   : > { %p2182_p7 = scmp.ge.s32.totalorder %s2180_s13, 2 }
 0x21a   : > { %p1251_p10 = pnand %p2182_p7, %p2181_p0 }
 0x21c   : > { %p1252_p13 = pneg %p1251_p10 }
 0x21e   : > { %1615 = dma.done.wait (%p1252_p13), %s902_s27, 256  }
 0x21f   : > { %1617 = vsyncadd (%p1252_p13), %s902_s27, 4294967040  ;;  %s2183_s24 = sadd.s32 4294967294, %s2180_s13  }
 0x220   : > { %s910_s22 = sand.u32 1, %s2183_s24  }
 0x221   : > { %s911_s3 = scalar_lea.sflag [#allocation15], %s910_s22 }
 0x222   : > { %1619 = dma.done.wait (%p1252_p13), %s911_s3, 512  }
 0x223   : > { %1621 = vsyncadd (%p1252_p13), %s911_s3, 4294966784  ;;  %s36_s22 = sadd.s32 1, %s2180_s13   ;;  %s2184_s20 = sld [smem:[#allocation28_spill]] }
 0x224   : > { %p33_p12 = scmp.ge.s32.totalorder %s36_s22, 4   ;;  %s2185_s26 = sld [smem:[#allocation24_spill]] }
 0x225   : > { %s2186_s21 = sld [smem:[#allocation27_spill]]  ;;  %s2187_s17 = smov %s1628_s18 }
 0x226   : > { %s2188_s18 = smov %s1632_s19  ;;  %35 = sbr.rel (!%p33_p12) target bundleno = 19 (0x13), region = 178 }
 0x229   : > { %s2189_s19 = smov %s2184_s20 }
 0x22a   : > { %s2190_s20 = smov %s2185_s26 }
 0x22b   :  { %925 = vsyncpa [#allocation3], 1 }
 0x22c   :  { %927 = vsyncpa [#allocation3 + $0x1], 1 }
 0x22d   :  { %928 = vsyncpa [#allocation6], 1 }
 0x22e   :  { %930 = vsyncpa [#allocation6 + $0x1], 1 }
 0x22f   :  { %931 = vsyncpa [#allocation9], 1 }
 0x230   :  { %932 = vsyncpa [#allocation12], 1 }
 0x231   :  { %933 = vsyncpa [#allocation4], 1 }
 0x232   :  { %935 = vsyncpa [#allocation4 + $0x1], 1 }
 0x233   :  { %936 = vsyncpa [#allocation15], 1 }
 0x234   :  { %938 = vsyncpa [#allocation15 + $0x1], 1 }

</bundles_post_ra>
